<compile_context>
chip_gen: v7x
topology: tpu7x:2x2x1
jax: 0.10.0
libtpu: 0.0.40
codegen_flags: <defaults>
</compile_context>

<pallas_src>
import jax
import jax.numpy as jnp
from jax.experimental import pallas as pl
from jax.experimental.pallas import tpu as pltpu

F_PAD = 128  # lane-dense padded feature width (one full vreg lane extent)


def net1_kernel(x_ref, wt_ref, b_ref, o_ref):
    # x_ref:  (TB, 128)   input tile (zero-padded lanes beyond feature 10)
    # wt_ref: (128, 128)  pre-transposed, zero-padded weight (in_features x out_features)
    # b_ref:  (1, 128)    zero-padded bias row (VMEM-resident across the grid)
    x = x_ref[...]
    # Full, unmasked MXU tile; contraction on the last dim of x against wt rows.
    y = jnp.dot(x, wt_ref[...], preferred_element_type=jnp.float32) + b_ref[...]
    # Keep the (degenerate) elementwise combine to match module semantics exactly.
    o_ref[...] = (x + 0.0 * y).astype(o_ref.dtype)


def net1_forward(x, weight, bias, *, max_tb=1024):
    """x: (B, F) f32, weight: (F, F) [out, in] like torch.nn.Linear, bias: (F,)."""
    B, F = x.shape
    assert weight.shape == (F, F) and bias.shape == (F,)

    # --- wrapper-side layout plumbing (done once, outside the kernel) ---------
    # Pad batch to a multiple of the f32 sublane count (8), pick a batch tile,
    # then pad batch to a multiple of that tile.
    b_sub = ((B + 7) // 8) * 8
    TB = min(max_tb, b_sub)
    Bp = ((b_sub + TB - 1) // TB) * TB

    x_p = jnp.pad(x, ((0, Bp - B), (0, F_PAD - F)))
    # Pre-transpose so the kernel never pushes a transpose through the XLU.
    wt_p = jnp.pad(weight.T, ((0, F_PAD - F), (0, F_PAD - F)))       # (128, 128)
    b_p = jnp.pad(bias.reshape(1, F), ((0, 0), (0, F_PAD - F)))       # (1, 128)

    grid = (Bp // TB,)
    out = pl.pallas_call(
        net1_kernel,
        out_shape=jax.ShapeDtypeStruct((Bp, F_PAD), x.dtype),
        grid=grid,
        in_specs=[
            pl.BlockSpec((TB, F_PAD), lambda i: (i, 0)),   # batch-tiled input
            pl.BlockSpec((F_PAD, F_PAD), lambda i: (0, 0)),  # weight: VMEM-resident
            pl.BlockSpec((1, F_PAD), lambda i: (0, 0)),      # bias:   VMEM-resident
        ],
        out_specs=pl.BlockSpec((TB, F_PAD), lambda i: (i, 0)),
        compiler_params=pltpu.CompilerParams(
            dimension_semantics=("parallel",),  # shard batch across TCs (v7x megacore)
        ),
    )(x_p, wt_p, b_p)

    # Slice the padding back off outside the kernel (lane-dense inside).
    return out[:B, :F]


if __name__ == "__main__":
    key = jax.random.PRNGKey(0)
    k_x, k_w, k_b = jax.random.split(key, 3)

    B, F = 8, 10  # torch.nn.Linear(10, 10) -> feature dim must be 10
    x = jax.random.normal(k_x, (B, F), dtype=jnp.float32)

    # Deterministic parameter init mimicking torch.nn.Linear default U[-1/sqrt(in), 1/sqrt(in)]
    bound = 1.0 / jnp.sqrt(jnp.float32(F))
    weight = jax.random.uniform(k_w, (F, F), minval=-bound, maxval=bound, dtype=jnp.float32)
    bias = jax.random.uniform(k_b, (F,), minval=-bound, maxval=bound, dtype=jnp.float32)

    out = net1_forward(x, weight, bias)
    out = jax.block_until_ready(out)

    # Reference: input1 + 0.0 * (input1 @ W^T + b)  (== input1 for finite inputs)
    ref = x + 0.0 * (x @ weight.T + bias)
    assert out.shape == (B, F)
    assert jnp.allclose(out, ref, atol=1e-6), "mismatch vs reference"

    print("KERNEL_OK")
</pallas_src>

<mosaic_0001>
module attributes {stable_mosaic.version = 11 : i64} {
  func.func @net1_kernel(%arg0: i32, %arg1: memref<8x128xf32, #tpu.memory_space<vmem>>, %arg2: memref<128x128xf32, #tpu.memory_space<vmem>>, %arg3: memref<1x128xf32, #tpu.memory_space<vmem>>, %arg4: memref<8x128xf32, #tpu.memory_space<vmem>>) attributes {dimension_semantics = [#tpu.dimension_semantics<parallel>], iteration_bounds = array<i64: 1>, scalar_prefetch = 0 : i64, scratch_operands = 0 : i64, tpu.core_type = #tpu.core_type<tc>, window_params = [{transform_indices = @transform_0, window_bounds = array<i64: 8, 128>}, {pipeline_mode = #tpu.pipeline_mode<synchronous>, transform_indices = @transform_1, window_bounds = array<i64: 128, 128>}, {pipeline_mode = #tpu.pipeline_mode<synchronous>, transform_indices = @transform_2, window_bounds = array<i64: 1, 128>}, {transform_indices = @transform_3, window_bounds = array<i64: 8, 128>}]} {
    %c0 = arith.constant 0 : index
    %c0_0 = arith.constant 0 : index
    %0 = vector.load %arg1[%c0, %c0_0] : memref<8x128xf32, #tpu.memory_space<vmem>>, vector<8x128xf32>
    %c0_1 = arith.constant 0 : index
    %c0_2 = arith.constant 0 : index
    %1 = vector.load %arg2[%c0_1, %c0_2] : memref<128x128xf32, #tpu.memory_space<vmem>>, vector<128x128xf32>
    %cst = arith.constant dense<0.000000e+00> : vector<8x128xf32>
    %2 = tpu.matmul %0, %1, %cst {dimension_numbers = #tpu.dot_dimension_numbers<[1], [0], [0], [1], [0, 0, 1, 1], [], []>} : vector<8x128xf32>, vector<128x128xf32>, vector<8x128xf32> -> vector<8x128xf32>
    %c0_3 = arith.constant 0 : index
    %c0_4 = arith.constant 0 : index
    %3 = vector.load %arg3[%c0_3, %c0_4] : memref<1x128xf32, #tpu.memory_space<vmem>>, vector<1x128xf32>
    %4 = vector.broadcast %3 : vector<1x128xf32> to vector<8x128xf32>
    %5 = arith.addf %2, %4 : vector<8x128xf32>
    %cst_5 = arith.constant 0.000000e+00 : f32
    %6 = vector.broadcast %cst_5 : f32 to vector<8x128xf32>
    %7 = arith.mulf %6, %5 : vector<8x128xf32>
    %8 = arith.addf %0, %7 : vector<8x128xf32>
    %c0_6 = arith.constant 0 : index
    %c0_7 = arith.constant 0 : index
    %9 = vector.load %arg4[%c0_6, %c0_7] : memref<8x128xf32, #tpu.memory_space<vmem>>, vector<8x128xf32>
    tpu.vector_store %arg4[%c0_6, %c0_7], %8 {strides = array<i32>} : memref<8x128xf32, #tpu.memory_space<vmem>>, vector<8x128xf32>,
    return
  }
  func.func @transform_0(%arg0: i32) -> (i32, i32) {
    %c0_i32 = arith.constant 0 : i32
    %c0_i32_0 = arith.constant 0 : i32
    return %arg0, %c0_i32 : i32, i32
  }
  func.func @transform_1(%arg0: i32) -> (i32, i32) {
    %c0_i32 = arith.constant 0 : i32
    %c0_i32_0 = arith.constant 0 : i32
    %c0_i32_1 = arith.constant 0 : i32
    return %c0_i32, %c0_i32_0 : i32, i32
  }
  func.func @transform_2(%arg0: i32) -> (i32, i32) {
    %c0_i32 = arith.constant 0 : i32
    %c0_i32_0 = arith.constant 0 : i32
    %c0_i32_1 = arith.constant 0 : i32
    return %c0_i32, %c0_i32_0 : i32, i32
  }
  func.func @transform_3(%arg0: i32) -> (i32, i32) {
    %c0_i32 = arith.constant 0 : i32
    %c0_i32_0 = arith.constant 0 : i32
    return %arg0, %c0_i32 : i32, i32
  }
}

</mosaic_0001>

<bundles_post_ra>
// kernel: tpu_custom_call.1
= control target key start
LH: loop header
LB: loop body
LE: loop exit
PB: predicated region body
PF: predicated region fallthrough
CT: control target
= control target key end

     0   :  { %8 = vsyncpa [#allocation3], 0  ;;  %s385_s0 = inlined_call_operand.hbm [shape: f32[8,128], index: 0, kind: input, shape index: {}]   ;;  %s386_s1 = inlined_call_operand.hbm [shape: f32[128,128], index: 1, kind: input, shape index: {}]   ;;  %s387_s2 = inlined_call_operand.vmem [shape: f32[1,128], index: 2, kind: input, shape index: {}]   ;;  %s388_s3 = inlined_call_operand.hbm [shape: f32[8,128], index: 3, kind: output, shape index: {}]  }
   0x1   :  { %9 = vsyncpa [#allocation6], 0 }
   0x2   :  { %10 = vsyncpa [#allocation4], 0  ;;  %s311_s12 = smov [#allocation2]   ;;  %s312_s14 = smov [#allocation5]  }
   0x3   :  { %s17_s13 = sshll.u32 %s311_s12, 4  ;;  %s26_s15 = sshll.u32 %s312_s14, 4  ;;  %s18_s13 = int_to_ptr.vmem [resolvable:$true] %s17_s13  ;;  %s339_s15 = int_to_ptr.vmem [resolvable:$true] %s26_s15 }
   0x4   :  { %s239_s18 = scalar_lea.hbm %s385_s0, 128 }
   0x5   :  { %p240_p0 = scmp.ne.s32.totalorder %s385_s0, %s239_s18  ;;  %p243_p1 = scmp.lt.u32.totalorder %s239_s18, %s385_s0 }
   0x7   :  { %p245_p2 = pnand %p243_p1, %p240_p0 }
   0x9   :  { %248 = shalt.err (!%p245_p2)
}
   0xa   :  { %s249_s23 = scalar_lea.vmem %s18_s13, 128  ;;  %p254_p4 = scmp.lt.s32.totalorder %s18_s13, %s18_s13 }
   0xb   :  { %p250_p3 = scmp.ne.s32.totalorder %s18_s13, %s249_s23  ;;  %p255_p5 = scmp.lt.s32.totalorder %s249_s23, %s249_s23 }
   0xd   :  { %p256_p6 = por %p255_p5, %p254_p4 }
   0xf   :  { %p257_p7 = pnand %p256_p6, %p250_p3 }
  0x11   :  { %260 = shalt.err (!%p257_p7)
}
  0x12   :  { %20 = dma.hbm_to_vmem [thread:$0]  %s385_s0, 128, %s18_s13, [#allocation3]  }
  0x13   :  { %s261_s28 = scalar_lea.hbm %s386_s1, 2048 }
  0x14   :  { %p262_p8 = scmp.ne.s32.totalorder %s386_s1, %s261_s28  ;;  %p265_p9 = scmp.lt.u32.totalorder %s261_s28, %s386_s1 }
  0x16   :  { %p267_p10 = pnand %p265_p9, %p262_p8 }
  0x18   :  { %270 = shalt.err (!%p267_p10)
}
  0x19   :  { %s271_s6 = scalar_lea.vmem %s339_s15, 2048  ;;  %p276_p12 = scmp.lt.s32.totalorder %s339_s15, %s339_s15 }
  0x1a   :  { %p272_p11 = scmp.ne.s32.totalorder %s339_s15, %s271_s6  ;;  %p277_p13 = scmp.lt.s32.totalorder %s271_s6, %s271_s6 }
  0x1c   :  { %p278_p0 = por %p277_p13, %p276_p12 }
  0x1e   :  { %p279_p1 = pnand %p278_p0, %p272_p11 }
  0x20   :  { %282 = shalt.err (!%p279_p1)
}
  0x21   :  { %s313_s0 = smov 128   ;;  %s314_s7 = smov 8  }
  0x22   :  { %32 = dma.hbm_to_vmem [thread:$0]  %s386_s1, 2048, %s339_s15, [#allocation6], %s313_s0, %s313_s0, %s314_s7  }
  0x23   :  { %305 = dma.done.wait [#allocation3], 128  }
  0x24   :  { %306 = vsyncadd [#allocation3], 4294967168 }
  0x25   :  { %307 = dma.done.wait [#allocation6], 2048  }
  0x26   :  { %308 = vsyncadd [#allocation6], 4294965248  ;;  %v315_v0 = vmov 0.0|0.0   ;;  %vm316_vm0 = vmmov 0   ;;  %v317_v1 = vmov 0.0   ;;  %v42_v2 = vld [vmem:[#allocation5] sm:$0xff] }
  0x27   :  { %207 = vmatprep.subr.bf16.mxu0 %v315_v0  ;;  %204 = vmatprep.mubr.msk.f32.mxu0 %vm316_vm0, %v317_v1  ;;  %v43_v3 = vld [vmem:[#allocation5 + $0x8] sm:$0xff]  ;;  %v44_v4 = vld [vmem:[#allocation5 + $0x10] sm:$0xff]  ;;  %v45_v6 = vld [vmem:[#allocation5 + $0x18] sm:$0xff]  ;;  %s318_s11 = smov [#allocation7]  }
  0x28   :  { %v208_v5 = vpack.c.bf16 %v43_v3, %v42_v2  ;;  %v211_v7 = vpack.c.bf16 %v45_v6, %v44_v4  ;;  %v46_v8 = vld [vmem:[#allocation5 + $0x20] sm:$0xff]  ;;  %v47_v9 = vld [vmem:[#allocation5 + $0x28] sm:$0xff]  ;;  %v48_v11 = vld [vmem:[#allocation5 + $0x30] sm:$0xff]  ;;  %s144_s12 = sshll.u32 %s318_s11, 4  ;;  %s145_s12 = int_to_ptr.vmem [resolvable:$true] %s144_s12 }
  0x29   :  { %v214_v10 = vpack.c.bf16 %v47_v9, %v46_v8  ;;  %v49_v12 = vld [vmem:[#allocation5 + $0x38] sm:$0xff]  ;;  %v50_v14 = vld [vmem:[#allocation5 + $0x40] sm:$0xff]  ;;  %v51_v15 = vld [vmem:[#allocation5 + $0x48] sm:$0xff]  ;;  %s283_s13 = scalar_lea.vmem %s145_s12, 128  ;;  %p288_p3 = scmp.lt.s32.totalorder %s145_s12, %s145_s12 }
  0x2a   :  { %209 = vmatpush3.bf16.msra.mxu0 %v208_v5  ;;  %v217_v13 = vpack.c.bf16 %v49_v12, %v48_v11  ;;  %v220_v16 = vpack.c.bf16 %v51_v15, %v50_v14  ;;  %v52_v17 = vld [vmem:[#allocation5 + $0x50] sm:$0xff]  ;;  %v53_v18 = vld [vmem:[#allocation5 + $0x58] sm:$0xff]  ;;  %v54_v20 = vld [vmem:[#allocation5 + $0x60] sm:$0xff]  ;;  %p284_p2 = scmp.ne.s32.totalorder %s145_s12, %s283_s13  ;;  %p289_p4 = scmp.lt.s32.totalorder %s283_s13, %s283_s13 }
  0x2b   :  { %210 = vmatprep.subr.bf16.mxu0 %v315_v0  ;;  %v223_v19 = vpack.c.bf16 %v53_v18, %v52_v17  ;;  %v55_v21 = vld [vmem:[#allocation5 + $0x68] sm:$0xff]  ;;  %v56_v23 = vld [vmem:[#allocation5 + $0x70] sm:$0xff]  ;;  %v57_v24 = vld [vmem:[#allocation5 + $0x78] sm:$0xff] }
  0x2c   :  { %v226_v22 = vpack.c.bf16 %v55_v21, %v54_v20  ;;  %v229_v25 = vpack.c.bf16 %v57_v24, %v56_v23  ;;  %v41_v26 = vld [vmem:[#allocation2] sm:$0xff]  ;;  %p290_p5 = por %p289_p4, %p288_p3 }
  0x2d   :  { %v154_v27 = vld [vmem:[%s387_s2] ss:$0 sm:$0xff] }
  0x2e   :  { %212 = vmatpush3.bf16.msra.mxu0 %v211_v7  ;;  %p291_p6 = pnand %p290_p5, %p284_p2 }
  0x2f   :  { %213 = vmatprep.subr.bf16.mxu0 %v315_v0 }
  0x32   :  { %215 = vmatpush3.bf16.msra.mxu0 %v214_v10 }
  0x33   :  { %216 = vmatprep.subr.bf16.mxu0 %v315_v0 }
  0x36   :  { %218 = vmatpush3.bf16.msra.mxu0 %v217_v13 }
  0x37   :  { %219 = vmatprep.subr.bf16.mxu0 %v315_v0 }
  0x3a   :  { %221 = vmatpush3.bf16.msra.mxu0 %v220_v16 }
  0x3b   :  { %222 = vmatprep.subr.bf16.mxu0 %v315_v0 }
  0x3e   :  { %224 = vmatpush3.bf16.msra.mxu0 %v223_v19 }
  0x3f   :  { %225 = vmatprep.subr.bf16.mxu0 %v315_v0 }
  0x42   :  { %227 = vmatpush3.bf16.msra.mxu0 %v226_v22 }
  0x43   :  { %228 = vmatprep.subr.bf16.mxu0 %v315_v0 }
  0x46   :  { %230 = vmatpush3.bf16.msra.mxu0 %v229_v25 }
  0x49   :  { %205 = vmatmul.mubr.f32.vlgmr.msra.gmra.mrb[0].mxu0 %v41_v26 }
 0x11c   :  { %v131_v28 = vpop.f32.mrb[0].mxu0 }
 0x11d   :  { %v132_v29 = vadd.f32 %v154_v27, %v131_v28  ;;  %v206_v30 = vpop.f32.mrb[1].mxu0 }
 0x11f   :  { %v135_v31 = vmul.f32 0.0, %v132_v29 }
 0x121   :  { %v136_v32 = vadd.f32 %v135_v31, %v41_v26 }
 0x123   :  { %137 = vst [vmem:[#allocation7] sm:$0xff] %v136_v32 }
 0x124   :  { %294 = shalt.err (!%p291_p6)
}
 0x125   :  { %s295_s2 = scalar_lea.hbm %s388_s3, 128 }
 0x126   :  { %p296_p7 = scmp.ne.s32.totalorder %s388_s3, %s295_s2  ;;  %p299_p8 = scmp.lt.u32.totalorder %s295_s2, %s388_s3 }
 0x128   :  { %p301_p9 = pnand %p299_p8, %p296_p7 }
 0x12a   :  { %304 = shalt.err (!%p301_p9)
}
 0x12b   :  { %147 = dma.vmem_to_hbm [thread:$0]  %s145_s12, 128, %s388_s3, [#allocation4]  }
 0x12c   :  { %309 = dma.done.wait [#allocation4], 128  }
 0x12d   :  { %310 = vsyncadd [#allocation4], 4294967168 }
 0x12e   :  { %151 = vsyncpa [#allocation3], 1 }
 0x12f   :  { %152 = vsyncpa [#allocation6], 1 }
 0x130   :  { %153 = vsyncpa [#allocation4], 1 }

</bundles_post_ra>
